<compile_context>
chip_gen: v5e
topology: v5e:2x2
jax: 0.10.0
libtpu: 0.0.40
codegen_flags: <defaults>
</compile_context>

<pallas_src>
import functools

import jax
import jax.numpy as jnp
from jax.experimental import pallas as pl
from jax.experimental.pallas import tpu as pltpu


def _round_up(x, m):
    return ((x + m - 1) // m) * m


def _actor_kernel(ma_ref, x_ref, w1_ref, b1_ref, w2_ref, b2_ref,
                  w3_ref, b3_ref, o_ref):
    """One batch tile: relu(x@W1+b1) -> relu(@W2+b2) -> max_action*tanh(@W3+b3)."""
    max_action = ma_ref[0, 0]                       # SMEM scalar (f32)

    x = x_ref[...].astype(jnp.bfloat16)             # bf16 operands, f32 accumulate
    h1 = jnp.dot(x, w1_ref[...], preferred_element_type=jnp.float32) + b1_ref[...]
    h1 = jnp.maximum(h1, 0.0).astype(jnp.bfloat16)  # ReLU in f32, cast for next dot

    h2 = jnp.dot(h1, w2_ref[...], preferred_element_type=jnp.float32) + b2_ref[...]
    h2 = jnp.maximum(h2, 0.0).astype(jnp.bfloat16)

    a = jnp.dot(h2, w3_ref[...], preferred_element_type=jnp.float32) + b3_ref[...]
    o_ref[...] = (max_action * jnp.tanh(a)).astype(o_ref.dtype)


def init_actor_params(key, state_dim, action_dim, hidden=256):
    """PyTorch nn.Linear-style uniform init; weights stored pre-transposed [in, out]."""
    ks = jax.random.split(key, 6)

    def linear(kw, kb, fan_in, fan_out):
        bound = 1.0 / jnp.sqrt(fan_in)
        w = jax.random.uniform(kw, (fan_in, fan_out), jnp.float32, -bound, bound)
        b = jax.random.uniform(kb, (1, fan_out), jnp.float32, -bound, bound)
        return w, b

    w1, b1 = linear(ks[0], ks[1], state_dim, hidden)
    w2, b2 = linear(ks[2], ks[3], hidden, hidden)
    w3, b3 = linear(ks[4], ks[5], hidden, action_dim)
    return {"w1": w1, "b1": b1, "w2": w2, "b2": b2, "w3": w3, "b3": b3}


def prepare_actor_params(params):
    """One-time inference prep: bf16 weights (halves weight DMA, native MXU dtype
    on v6e/v7x) and lane-padded final layer (output last dim -> multiple of 128
    for unmasked stores).  f32 master copies stay with the caller for training."""
    action_dim = params["w3"].shape[1]
    act_pad = _round_up(action_dim, 128)
    pad = act_pad - action_dim
    w3p = jnp.pad(params["w3"], ((0, 0), (0, pad)))
    b3p = jnp.pad(params["b3"], ((0, 0), (0, pad)))
    return {
        "w1": params["w1"].astype(jnp.bfloat16), "b1": params["b1"],
        "w2": params["w2"].astype(jnp.bfloat16), "b2": params["b2"],
        "w3": w3p.astype(jnp.bfloat16),          "b3": b3p,
        "action_dim": action_dim,
    }


@functools.partial(jax.jit, static_argnames=("action_dim", "tile_m"))
def _actor_forward_impl(state, w1, b1, w2, b2, w3, b3, max_action,
                        *, action_dim, tile_m):
    B, state_dim = state.shape
    act_pad = w3.shape[1]

    # Batch tiling: tm rows per grid step (sublane-aligned); pad B to a whole
    # number of tiles.  Weights stay VMEM-resident; states/actions stream.
    tm = min(tile_m, _round_up(B, 8))
    Bp = _round_up(B, tm)
    state_p = jnp.pad(state, ((0, Bp - B), (0, 0))) if Bp != B else state

    ma = jnp.full((1, 1), max_action, jnp.float32)

    def resident(arr):
        # Full-array block whose index never changes -> DMA'd once, stays in VMEM.
        return pl.BlockSpec(arr.shape, lambda i: (0, 0))

    out = pl.pallas_call(
        _actor_kernel,
        out_shape=jax.ShapeDtypeStruct((Bp, act_pad), jnp.float32),
        grid=(Bp // tm,),
        in_specs=[
            pl.BlockSpec(memory_space=pltpu.MemorySpace.SMEM),   # max_action scalar
            pl.BlockSpec((tm, state_dim), lambda i: (i, 0)),     # streamed states
            resident(w1), resident(b1),
            resident(w2), resident(b2),
            resident(w3), resident(b3),
        ],
        out_specs=pl.BlockSpec((tm, act_pad), lambda i: (i, 0)),
        compiler_params=pltpu.CompilerParams(
            dimension_semantics=("parallel",)),   # v7x: shard batch tiles over 2 TCs
    )(ma, state_p, w1, b1, w2, b2, w3, b3)

    return out[:B, :action_dim]


def actor_forward(state, prepared, max_action, *, tile_m=128):
    """state: [B, state_dim] f32.  prepared: output of prepare_actor_params."""
    return _actor_forward_impl(
        state, prepared["w1"], prepared["b1"], prepared["w2"], prepared["b2"],
        prepared["w3"], prepared["b3"], jnp.float32(max_action),
        action_dim=prepared["action_dim"], tile_m=tile_m)


def actor_reference(state, params, max_action):
    """Pure-JAX f32 reference matching the PyTorch Actor.forward."""
    h1 = jnp.maximum(state @ params["w1"] + params["b1"], 0.0)
    h2 = jnp.maximum(h1 @ params["w2"] + params["b2"], 0.0)
    return max_action * jnp.tanh(h2 @ params["w3"] + params["b3"])


if __name__ == "__main__":
    # HalfCheetahBulletEnv-like dims: state_dim=26, action_dim=6.
    B, STATE_DIM, ACTION_DIM = 8, 26, 6
    MAX_ACTION = 1.0

    key = jax.random.PRNGKey(0)
    k_params, k_state = jax.random.split(key)
    params = init_actor_params(k_params, STATE_DIM, ACTION_DIM)
    prepared = prepare_actor_params(params)
    state = jax.random.normal(k_state, (B, STATE_DIM), jnp.float32)

    out = jax.block_until_ready(actor_forward(state, prepared, MAX_ACTION))
    ref = jax.block_until_ready(actor_reference(state, params, MAX_ACTION))

    assert out.shape == (B, ACTION_DIM)
    # bf16 matmul operands (f32 accumulation) -> loose-but-tight-enough tolerance.
    assert jnp.allclose(out, ref, atol=2e-2, rtol=2e-2), (
        float(jnp.max(jnp.abs(out - ref))))

    print("KERNEL_OK")
</pallas_src>

<mosaic_0001>
module attributes {stable_mosaic.version = 11 : i64} {
  func.func @_actor_kernel(%arg0: i32, %arg1: memref<1x1xf32, #tpu.memory_space<smem>>, %arg2: memref<8x26xf32, #tpu.memory_space<vmem>>, %arg3: memref<26x256xbf16, #tpu.memory_space<vmem>>, %arg4: memref<1x256xf32, #tpu.memory_space<vmem>>, %arg5: memref<256x256xbf16, #tpu.memory_space<vmem>>, %arg6: memref<1x256xf32, #tpu.memory_space<vmem>>, %arg7: memref<256x128xbf16, #tpu.memory_space<vmem>>, %arg8: memref<1x128xf32, #tpu.memory_space<vmem>>, %arg9: memref<8x128xf32, #tpu.memory_space<vmem>>) attributes {dimension_semantics = [#tpu.dimension_semantics<parallel>], iteration_bounds = array<i64: 1>, scalar_prefetch = 0 : i64, scratch_operands = 0 : i64, tpu.core_type = #tpu.core_type<tc>, window_params = [{transform_indices = @transform_0, window_bounds = array<i64: 1, 1>}, {transform_indices = @transform_1, window_bounds = array<i64: 8, 26>}, {pipeline_mode = #tpu.pipeline_mode<synchronous>, transform_indices = @transform_2, window_bounds = array<i64: 26, 256>}, {pipeline_mode = #tpu.pipeline_mode<synchronous>, transform_indices = @transform_3, window_bounds = array<i64: 1, 256>}, {pipeline_mode = #tpu.pipeline_mode<synchronous>, transform_indices = @transform_4, window_bounds = array<i64: 256, 256>}, {pipeline_mode = #tpu.pipeline_mode<synchronous>, transform_indices = @transform_5, window_bounds = array<i64: 1, 256>}, {pipeline_mode = #tpu.pipeline_mode<synchronous>, transform_indices = @transform_6, window_bounds = array<i64: 256, 128>}, {pipeline_mode = #tpu.pipeline_mode<synchronous>, transform_indices = @transform_7, window_bounds = array<i64: 1, 128>}, {transform_indices = @transform_8, window_bounds = array<i64: 8, 128>}]} {
    %c0 = arith.constant 0 : index
    %c0_0 = arith.constant 0 : index
    %0 = memref.load %arg1[%c0, %c0_0] : memref<1x1xf32, #tpu.memory_space<smem>>
    %c0_1 = arith.constant 0 : index
    %c0_2 = arith.constant 0 : index
    %1 = vector.load %arg2[%c0_1, %c0_2] : memref<8x26xf32, #tpu.memory_space<vmem>>, vector<8x26xf32>
    %2 = arith.truncf %1 : vector<8x26xf32> to vector<8x26xbf16>
    %c0_3 = arith.constant 0 : index
    %c0_4 = arith.constant 0 : index
    %3 = vector.load %arg3[%c0_3, %c0_4] : memref<26x256xbf16, #tpu.memory_space<vmem>>, vector<26x256xbf16>
    %cst = arith.constant dense<0.000000e+00> : vector<8x256xf32>
    %4 = tpu.matmul %2, %3, %cst {dimension_numbers = #tpu.dot_dimension_numbers<[1], [0], [0], [1], [0, 0, 1, 1], [], []>} : vector<8x26xbf16>, vector<26x256xbf16>, vector<8x256xf32> -> vector<8x256xf32>
    %c0_5 = arith.constant 0 : index
    %c0_6 = arith.constant 0 : index
    %5 = vector.load %arg4[%c0_5, %c0_6] : memref<1x256xf32, #tpu.memory_space<vmem>>, vector<1x256xf32>
    %6 = vector.broadcast %5 : vector<1x256xf32> to vector<8x256xf32>
    %7 = arith.addf %4, %6 : vector<8x256xf32>
    %cst_7 = arith.constant 0.000000e+00 : f32
    %8 = vector.broadcast %cst_7 : f32 to vector<8x256xf32>
    %9 = arith.maximumf %7, %8 : vector<8x256xf32>
    %10 = arith.truncf %9 : vector<8x256xf32> to vector<8x256xbf16>
    %c0_8 = arith.constant 0 : index
    %c0_9 = arith.constant 0 : index
    %11 = vector.load %arg5[%c0_8, %c0_9] : memref<256x256xbf16, #tpu.memory_space<vmem>>, vector<256x256xbf16>
    %cst_10 = arith.constant dense<0.000000e+00> : vector<8x256xf32>
    %12 = tpu.matmul %10, %11, %cst_10 {dimension_numbers = #tpu.dot_dimension_numbers<[1], [0], [0], [1], [0, 0, 1, 1], [], []>} : vector<8x256xbf16>, vector<256x256xbf16>, vector<8x256xf32> -> vector<8x256xf32>
    %c0_11 = arith.constant 0 : index
    %c0_12 = arith.constant 0 : index
    %13 = vector.load %arg6[%c0_11, %c0_12] : memref<1x256xf32, #tpu.memory_space<vmem>>, vector<1x256xf32>
    %14 = vector.broadcast %13 : vector<1x256xf32> to vector<8x256xf32>
    %15 = arith.addf %12, %14 : vector<8x256xf32>
    %cst_13 = arith.constant 0.000000e+00 : f32
    %16 = vector.broadcast %cst_13 : f32 to vector<8x256xf32>
    %17 = arith.maximumf %15, %16 : vector<8x256xf32>
    %18 = arith.truncf %17 : vector<8x256xf32> to vector<8x256xbf16>
    %c0_14 = arith.constant 0 : index
    %c0_15 = arith.constant 0 : index
    %19 = vector.load %arg7[%c0_14, %c0_15] : memref<256x128xbf16, #tpu.memory_space<vmem>>, vector<256x128xbf16>
    %cst_16 = arith.constant dense<0.000000e+00> : vector<8x128xf32>
    %20 = tpu.matmul %18, %19, %cst_16 {dimension_numbers = #tpu.dot_dimension_numbers<[1], [0], [0], [1], [0, 0, 1, 1], [], []>} : vector<8x256xbf16>, vector<256x128xbf16>, vector<8x128xf32> -> vector<8x128xf32>
    %c0_17 = arith.constant 0 : index
    %c0_18 = arith.constant 0 : index
    %21 = vector.load %arg8[%c0_17, %c0_18] : memref<1x128xf32, #tpu.memory_space<vmem>>, vector<1x128xf32>
    %22 = vector.broadcast %21 : vector<1x128xf32> to vector<8x128xf32>
    %23 = arith.addf %20, %22 : vector<8x128xf32>
    %24 = math.tanh %23 : vector<8x128xf32>
    %25 = vector.broadcast %0 : f32 to vector<8x128xf32>
    %26 = arith.mulf %25, %24 : vector<8x128xf32>
    %c0_19 = arith.constant 0 : index
    %c0_20 = arith.constant 0 : index
    %27 = vector.load %arg9[%c0_19, %c0_20] : memref<8x128xf32, #tpu.memory_space<vmem>>, vector<8x128xf32>
    tpu.vector_store %arg9[%c0_19, %c0_20], %26 {strides = array<i32>} : memref<8x128xf32, #tpu.memory_space<vmem>>, vector<8x128xf32>,
    return
  }
  func.func @transform_0(%arg0: i32) -> (i32, i32) {
    %c0_i32 = arith.constant 0 : i32
    %c0_i32_0 = arith.constant 0 : i32
    %c0_i32_1 = arith.constant 0 : i32
    return %c0_i32, %c0_i32_0 : i32, i32
  }
  func.func @transform_1(%arg0: i32) -> (i32, i32) {
    %c0_i32 = arith.constant 0 : i32
    %c0_i32_0 = arith.constant 0 : i32
    return %arg0, %c0_i32 : i32, i32
  }
  func.func @transform_2(%arg0: i32) -> (i32, i32) {
    %c0_i32 = arith.constant 0 : i32
    %c0_i32_0 = arith.constant 0 : i32
    %c0_i32_1 = arith.constant 0 : i32
    return %c0_i32, %c0_i32_0 : i32, i32
  }
  func.func @transform_3(%arg0: i32) -> (i32, i32) {
    %c0_i32 = arith.constant 0 : i32
    %c0_i32_0 = arith.constant 0 : i32
    %c0_i32_1 = arith.constant 0 : i32
    return %c0_i32, %c0_i32_0 : i32, i32
  }
  func.func @transform_4(%arg0: i32) -> (i32, i32) {
    %c0_i32 = arith.constant 0 : i32
    %c0_i32_0 = arith.constant 0 : i32
    %c0_i32_1 = arith.constant 0 : i32
    return %c0_i32, %c0_i32_0 : i32, i32
  }
  func.func @transform_5(%arg0: i32) -> (i32, i32) {
    %c0_i32 = arith.constant 0 : i32
    %c0_i32_0 = arith.constant 0 : i32
    %c0_i32_1 = arith.constant 0 : i32
    return %c0_i32, %c0_i32_0 : i32, i32
  }
  func.func @transform_6(%arg0: i32) -> (i32, i32) {
    %c0_i32 = arith.constant 0 : i32
    %c0_i32_0 = arith.constant 0 : i32
    %c0_i32_1 = arith.constant 0 : i32
    return %c0_i32, %c0_i32_0 : i32, i32
  }
  func.func @transform_7(%arg0: i32) -> (i32, i32) {
    %c0_i32 = arith.constant 0 : i32
    %c0_i32_0 = arith.constant 0 : i32
    %c0_i32_1 = arith.constant 0 : i32
    return %c0_i32, %c0_i32_0 : i32, i32
  }
  func.func @transform_8(%arg0: i32) -> (i32, i32) {
    %c0_i32 = arith.constant 0 : i32
    %c0_i32_0 = arith.constant 0 : i32
    return %arg0, %c0_i32 : i32, i32
  }
}

</mosaic_0001>

<bundles_post_ra>
// kernel: _actor_forward_impl.1
= control target key start
LH: loop header
LB: loop body
LE: loop exit
PB: predicated region body
PF: predicated region fallthrough
CT: control target
= control target key end

     0   :  { %14 = vsyncpa [#allocation4], 0  ;;  %s1087_s0 = inlined_call_operand.<no memory space> [shape: f32[1,1], index: 0, kind: input, shape index: {}]   ;;  %s1088_s1 = inlined_call_operand.hbm [shape: f32[8,26], index: 1, kind: input, shape index: {}]   ;;  %s1089_s2 = inlined_call_operand.hbm [shape: bf16[26,256], index: 2, kind: input, shape index: {}]   ;;  %s1090_s3 = inlined_call_operand.vmem [shape: f32[1,256], index: 3, kind: input, shape index: {}]   ;;  %s1091_s4 = inlined_call_operand.hbm [shape: bf16[256,256], index: 4, kind: input, shape index: {}]   ;;  %s1092_s5 = inlined_call_operand.vmem [shape: f32[1,256], index: 5, kind: input, shape index: {}]   ;;  %s1093_s6 = inlined_call_operand.hbm [shape: bf16[256,128], index: 6, kind: input, shape index: {}]   ;;  %s1094_s7 = inlined_call_operand.vmem [shape: f32[1,128], index: 7, kind: input, shape index: {}]   ;;  %s1095_s8 = inlined_call_operand.hbm [shape: f32[8,128], index: 8, kind: output, shape index: {}]  }
   0x1   :  { %15 = vsyncpa [#allocation7], 0 }
   0x2   :  { %16 = vsyncpa [#allocation10], 0  ;;  %s35_s29 = sshll.u32 %s1089_s2, 4  ;;  %s36_s29 = int_to_ptr.hbm [resolvable:$true] %s35_s29 }
   0x3   :  { %17 = vsyncpa [#allocation5], 0  ;;  %s1002_s30 = smov [#allocation6]   ;;  %s25_s12 = sshll.u32 %s1088_s1, 4  ;;  %s26_s12 = int_to_ptr.hbm [resolvable:$true] %s25_s12 }
   0x4   :  { %s37_s9 = sshll.u32 %s1002_s30, 4  ;;  %s1003_s13 = smov 128   ;;  %s38_s9 = int_to_ptr.vmem [resolvable:$true] %s37_s9 }
   0x5   :  { %s1004_s14 = smov 8   ;;  %s1005_s15 = smov [#allocation3]  }
   0x6   :  { %43 = dma.hbm_to_vmem [thread:$0]  %s36_s29, 512, %s38_s9, [#allocation7], %s1003_s13, %s1003_s13, %s1004_s14  }
   0x7   :  { %s27_s16 = sshll.u32 %s1005_s15, 4  ;;  %s50_s19 = sshll.u32 %s1091_s4, 4  ;;  %s28_s16 = int_to_ptr.vmem [resolvable:$true] %s27_s16  ;;  %s51_s19 = int_to_ptr.hbm [resolvable:$true] %s50_s19 }
   0x8   :  { %30 = dma.hbm_to_vmem [thread:$0]  %s26_s12, 128, %s28_s16, [#allocation4]  }
   0x9   :  { %s65_s21 = sshll.u32 %s1093_s6, 4  ;;  %s1006_s22 = smov [#allocation8]   ;;  %s66_s21 = int_to_ptr.hbm [resolvable:$true] %s65_s21 }
   0xa   :  { %s52_s23 = sshll.u32 %s1006_s22, 4  ;;  %s1007_s1 = smov [#allocation9]   ;;  %s53_s23 = int_to_ptr.vmem [resolvable:$true] %s52_s23 }
   0xb   :  { %58 = dma.hbm_to_vmem [thread:$0]  %s51_s19, 4096, %s53_s23, [#allocation7], %s1003_s13, %s1003_s13, %s1004_s14  }
   0xc   :  { %s67_s24 = sshll.u32 %s1007_s1, 4  ;;  %s1008_s25 = smov 64   ;;  %s68_s24 = int_to_ptr.vmem [resolvable:$true] %s67_s24 }
   0xd   :  { %s1009_s26 = smov 4  }
   0xe   :  { %73 = dma.hbm_to_vmem [thread:$0]  %s66_s21, 2048, %s68_s24, [#allocation10], %s1008_s25, %s1008_s25, %s1009_s26  }
   0xf   :  { %994 = dma.done.wait [#allocation4], 128  }
  0x10   :  { %995 = vsyncadd [#allocation4], 4294967168 }
  0x11   :  { %996 = dma.done.wait [#allocation7], 4608  }
  0x12   :  { %997 = vsyncadd [#allocation7], 4294962688 }
  0x13   :  { %998 = dma.done.wait [#allocation10], 2048  }
  0x14   :  { %999 = vsyncadd [#allocation10], 4294965248  ;;  %vm128_vm0 = vcmask 1044480   ;;  %v610_v0 = vld [vmem:[#allocation6 + $0x10] sm:$0xf]  ;;  %vm124_vm1 = vcmask 211968  }
  0x15   :  { %v813_v1 = vld [vmem:[#allocation6 + $0x14] sm:$0x10]  ;;  %v812_v2 = vld [vmem:[#allocation6 + $0x14] sm:$0xf]  ;;  %v612_v4 = vld [vmem:[#allocation6 + $0x18] sm:$0x10] }
  0x16   :  { %v611_v3 = vor.u32 %v813_v1, %v610_v0  ;;  %v602_v5 = vld [vmem:[#allocation6] sm:$0xf]  ;;  %v811_v6 = vld [vmem:[#allocation6 + $0x4] sm:$0xf0]  ;;  %v615_v7 = vor.u32 %v812_v2, %v612_v4  ;;  %v810_v8 = vld [vmem:[#allocation6 + $0x4] sm:$0xf] }
  0x17   :  { %v604_v9 = vld [vmem:[#allocation6 + $0x8] sm:$0xf0]  ;;  %v676_v11 = vld [vmem:[#allocation8 + $0x70] sm:$0xf]  ;;  %v829_v12 = vld [vmem:[#allocation8 + $0x74] sm:$0xf0]  ;;  %v603_v14 = vor.u32 %v811_v6, %v602_v5 }
  0x18   :  { %v130_v10 = vsel %vm128_vm0, %v611_v3, 0  ;;  %v133_v13 = vsel %vm128_vm0, %v615_v7, 0  ;;  %v94_v15 = vld [vmem:[#allocation3] sm:$0xff]  ;;  %v677_v16 = vor.u32 %v829_v12, %v676_v11  ;;  %v740_v17 = vld [vmem:[#allocation8 + $0xf0] sm:$0xf]  ;;  %v607_v19 = vor.u32 %v810_v8, %v604_v9  ;;  %s1010_s9 = smov [#allocation11]  }
  0x19   :  { %141 = vmatpush.bf16.msra.mxu0 %v130_v10  ;;  %v845_v18 = vld [vmem:[#allocation8 + $0xf4] sm:$0xf0]  ;;  %154 = vmatpush.bf16.msra.mxu1 %v133_v13  ;;  %v828_v21 = vld [vmem:[#allocation8 + $0x74] sm:$0xf]  ;;  %v678_v22 = vld [vmem:[#allocation8 + $0x78] sm:$0xf0]  ;;  %v95_v28 = vpack.c.bf16 %v94_v15, %v94_v15 }
  0x1a   :  { %v741_v20 = vor.u32 %v845_v18, %v740_v17  ;;  %v844_v23 = vld [vmem:[#allocation8 + $0xf4] sm:$0xf]  ;;  %363 = vmatpush.bf16.msra.mxu2 %v677_v16  ;;  %v681_v24 = vor.u32 %v828_v21, %v678_v22  ;;  %v742_v25 = vld [vmem:[#allocation8 + $0xf8] sm:$0xf0]  ;;  %v668_v26 = vld [vmem:[#allocation8 + $0x60] sm:$0xf] }
  0x1b   :  { %v827_v27 = vld [vmem:[#allocation8 + $0x64] sm:$0xf0]  ;;  %v745_v29 = vor.u32 %v844_v23, %v742_v25  ;;  %v732_v31 = vld [vmem:[#allocation8 + $0xe0] sm:$0xf]  ;;  %v826_v33 = vld [vmem:[#allocation8 + $0x64] sm:$0xf] }
  0x1c   :  { %376 = vmatpush.bf16.msra.mxu3 %v741_v20  ;;  %v669_v30 = vor.u32 %v827_v27, %v668_v26  ;;  %v843_v32 = vld [vmem:[#allocation8 + $0xe4] sm:$0xf0]  ;;  %v670_v35 = vld [vmem:[#allocation8 + $0x68] sm:$0xf0]  ;;  %v842_v36 = vld [vmem:[#allocation8 + $0xe4] sm:$0xf] }
  0x1d   :  { %142 = vmatpush.bf16.msra.mxu0 %v603_v14  ;;  %v733_v34 = vor.u32 %v843_v32, %v732_v31  ;;  %v734_v37 = vld [vmem:[#allocation8 + $0xe8] sm:$0xf0]  ;;  %155 = vmatpush.bf16.msra.mxu1 %v607_v19  ;;  %v673_v38 = vor.u32 %v826_v33, %v670_v35  ;;  %v660_v39 = vld [vmem:[#allocation8 + $0x50] sm:$0xf]  ;;  %v825_v40 = vld [vmem:[#allocation8 + $0x54] sm:$0xf0] }
  0x1e   :  { %v724_v41 = vld [vmem:[#allocation8 + $0xd0] sm:$0xf]  ;;  %364 = vmatpush.bf16.msra.mxu2 %v669_v30  ;;  %v737_v42 = vor.u32 %v842_v36, %v734_v37  ;;  %v661_v43 = vor.u32 %v825_v40, %v660_v39  ;;  %v841_v44 = vld [vmem:[#allocation8 + $0xd4] sm:$0xf0]  ;;  %v824_v45 = vld [vmem:[#allocation8 + $0x54] sm:$0xf] }
  0x1f   :  { %v662_v46 = vld [vmem:[#allocation8 + $0x58] sm:$0xf0]  ;;  %v725_v47 = vor.u32 %v841_v44, %v724_v41  ;;  %v840_v48 = vld [vmem:[#allocation8 + $0xd4] sm:$0xf]  ;;  %v652_v50 = vld [vmem:[#allocation8 + $0x40] sm:$0xf] }
  0x20   :  { %616 = vmatmul.msk.bf16.vlgmr.msra.gmra.mxu0 %vm124_vm1, %v95_v28  ;;  %377 = vmatpush.bf16.msra.mxu3 %v733_v34  ;;  %v726_v49 = vld [vmem:[#allocation8 + $0xd8] sm:$0xf0]  ;;  %v823_v51 = vld [vmem:[#allocation8 + $0x44] sm:$0xf0]  ;;  %v716_v52 = vld [vmem:[#allocation8 + $0xc0] sm:$0xf]  ;;  %v665_v54 = vor.u32 %v824_v45, %v662_v46 }
  0x21   :  { %389 = vmatpush.bf16.msrb.mxu0 %v681_v24  ;;  %402 = vmatpush.bf16.msrb.mxu1 %v745_v29  ;;  %v839_v53 = vld [vmem:[#allocation8 + $0xc4] sm:$0xf0]  ;;  %v729_v55 = vor.u32 %v840_v48, %v726_v49  ;;  %v653_v56 = vor.u32 %v823_v51, %v652_v50  ;;  %v822_v57 = vld [vmem:[#allocation8 + $0x44] sm:$0xf]  ;;  %v654_v58 = vld [vmem:[#allocation8 + $0x48] sm:$0xf0] }
  0x22   :  { %617 = vmatmul.msk.bf16.vlgmr.msra.gmra.mxu1 %vm124_vm1, %v95_v28  ;;  %365 = vmatpush.bf16.msra.mxu2 %v661_v43  ;;  %v838_v59 = vld [vmem:[#allocation8 + $0xc4] sm:$0xf]  ;;  %v717_v60 = vor.u32 %v839_v53, %v716_v52  ;;  %v718_v61 = vld [vmem:[#allocation8 + $0xc8] sm:$0xf0]  ;;  %v644_v62 = vld [vmem:[#allocation8 + $0x30] sm:$0xf]  ;;  %v657_v2 = vor.u32 %v822_v57, %v654_v58 }
  0x23   :  { %v821_v63 = vld [vmem:[#allocation8 + $0x34] sm:$0xf0]  ;;  %v708_v0 = vld [vmem:[#allocation8 + $0xb0] sm:$0xf]  ;;  %v721_v3 = vor.u32 %v838_v59, %v718_v61  ;;  %v820_v5 = vld [vmem:[#allocation8 + $0x34] sm:$0xf] }
  0x24   :  { %378 = vmatpush.bf16.msra.mxu3 %v725_v47  ;;  %v837_v1 = vld [vmem:[#allocation8 + $0xb4] sm:$0xf0]  ;;  %v645_v4 = vor.u32 %v821_v63, %v644_v62  ;;  %v646_v6 = vld [vmem:[#allocation8 + $0x38] sm:$0xf0]  ;;  %v836_v7 = vld [vmem:[#allocation8 + $0xb4] sm:$0xf] }
  0x25   :  { %390 = vmatpush.bf16.msrb.mxu0 %v673_v38  ;;  %403 = vmatpush.bf16.msrb.mxu1 %v737_v42  ;;  %v709_v8 = vor.u32 %v837_v1, %v708_v0  ;;  %v710_v9 = vld [vmem:[#allocation8 + $0xb8] sm:$0xf0]  ;;  %v636_v10 = vld [vmem:[#allocation8 + $0x20] sm:$0xf]  ;;  %v819_v11 = vld [vmem:[#allocation8 + $0x24] sm:$0xf0]  ;;  %v649_v14 = vor.u32 %v820_v5, %v646_v6 }
  0x26   :  { %366 = vmatpush.bf16.msra.mxu2 %v653_v56  ;;  %v700_v12 = vld [vmem:[#allocation8 + $0xa0] sm:$0xf]  ;;  %v835_v13 = vld [vmem:[#allocation8 + $0xa4] sm:$0xf0]  ;;  %v713_v15 = vor.u32 %v836_v7, %v710_v9  ;;  %v637_v16 = vor.u32 %v819_v11, %v636_v10  ;;  %v818_v17 = vld [vmem:[#allocation8 + $0x24] sm:$0xf] }
  0x27   :  { %v638_v18 = vld [vmem:[#allocation8 + $0x28] sm:$0xf0]  ;;  %v701_v19 = vor.u32 %v835_v13, %v700_v12  ;;  %v834_v20 = vld [vmem:[#allocation8 + $0xa4] sm:$0xf]  ;;  %v628_v24 = vld [vmem:[#allocation8 + $0x10] sm:$0xf] }
  0x28   :  { %379 = vmatpush.bf16.msra.mxu3 %v717_v60  ;;  %v702_v21 = vld [vmem:[#allocation8 + $0xa8] sm:$0xf0]  ;;  %v641_v22 = vor.u32 %v818_v17, %v638_v18  ;;  %v817_v25 = vld [vmem:[#allocation8 + $0x14] sm:$0xf0]  ;;  %v692_v26 = vld [vmem:[#allocation8 + $0x90] sm:$0xf] }
  0x29   :  { %391 = vmatpush.bf16.msrb.mxu0 %v665_v54  ;;  %404 = vmatpush.bf16.msrb.mxu1 %v729_v55  ;;  %v705_v23 = vor.u32 %v834_v20, %v702_v21  ;;  %v629_v27 = vor.u32 %v817_v25, %v628_v24  ;;  %v833_v28 = vld [vmem:[#allocation8 + $0x94] sm:$0xf0]  ;;  %v816_v29 = vld [vmem:[#allocation8 + $0x14] sm:$0xf]  ;;  %v630_v30 = vld [vmem:[#allocation8 + $0x18] sm:$0xf0] }
  0x2a   :  { %367 = vmatpush.bf16.msra.mxu2 %v645_v4  ;;  %v693_v31 = vor.u32 %v833_v28, %v692_v26  ;;  %v633_v32 = vor.u32 %v816_v29, %v630_v30  ;;  %v832_v33 = vld [vmem:[#allocation8 + $0x94] sm:$0xf]  ;;  %v694_v34 = vld [vmem:[#allocation8 + $0x98] sm:$0xf0]  ;;  %v620_v36 = vld [vmem:[#allocation8] sm:$0xf] }
  0x2b   :  { %v697_v35 = vor.u32 %v832_v33, %v694_v34  ;;  %v815_v37 = vld [vmem:[#allocation8 + $0x4] sm:$0xf0]  ;;  %v684_v38 = vld [vmem:[#allocation8 + $0x80] sm:$0xf]  ;;  %v814_v41 = vld [vmem:[#allocation8 + $0x4] sm:$0xf] }
  0x2c   :  { %380 = vmatpush.bf16.msra.mxu3 %v709_v8  ;;  %v621_v39 = vor.u32 %v815_v37, %v620_v36  ;;  %v831_v40 = vld [vmem:[#allocation8 + $0x84] sm:$0xf0]  ;;  %v622_v42 = vld [vmem:[#allocation8 + $0x8] sm:$0xf0]  ;;  %v830_v45 = vld [vmem:[#allocation8 + $0x84] sm:$0xf] }
  0x2d   :  { %392 = vmatpush.bf16.msrb.mxu0 %v657_v2  ;;  %405 = vmatpush.bf16.msrb.mxu1 %v721_v3  ;;  %v685_v43 = vor.u32 %v831_v40, %v684_v38  ;;  %v625_v44 = vor.u32 %v814_v41, %v622_v42  ;;  %v686_v46 = vld [vmem:[#allocation8 + $0x88] sm:$0xf0]  ;;  %v861_v48 = vld [vmem:[#allocation9 + $0x78] sm:$0xff]  ;;  %v860_v50 = vld [vmem:[#allocation9 + $0x70] sm:$0xff]  ;;  %s586_s10 = sshll.u32 %s1010_s9, 4  ;;  %s588_s13 = sshll.u32 %s1095_s8, 4  ;;  %s587_s10 = int_to_ptr.vmem [resolvable:$true] %s586_s10  ;;  %s589_s13 = int_to_ptr.hbm [resolvable:$true] %s588_s13 }
  0x2e   :  { %368 = vmatpush.bf16.msra.mxu2 %v637_v16  ;;  %v689_v47 = vor.u32 %v830_v45, %v686_v46  ;;  %v853_v49 = vld [vmem:[#allocation9 + $0x38] sm:$0xff]  ;;  %v852_v51 = vld [vmem:[#allocation9 + $0x30] sm:$0xff]  ;;  %v859_v52 = vld [vmem:[#allocation9 + $0x68] sm:$0xff] }
  0x2f   :  { %v851_v53 = vld [vmem:[#allocation9 + $0x28] sm:$0xff]  ;;  %v858_v54 = vld [vmem:[#allocation9 + $0x60] sm:$0xff]  ;;  %v857_v56 = vld [vmem:[#allocation9 + $0x58] sm:$0xff] }
  0x30   :  { %381 = vmatpush.bf16.msra.mxu3 %v701_v19  ;;  %v850_v55 = vld [vmem:[#allocation9 + $0x20] sm:$0xff]  ;;  %v100_v57 = vld [vmem:[%s1090_s3] sm:$0x3]  ;;  %v856_v58 = vld [vmem:[#allocation9 + $0x50] sm:$0xff] }
  0x31   :  { %393 = vmatpush.bf16.msrb.mxu0 %v649_v14  ;;  %406 = vmatpush.bf16.msrb.mxu1 %v713_v15  ;;  %v102_v59 = vperm.slane %v100_v57, 0  ;;  %v103_v60 = vperm.slane %v100_v57, 1  ;;  %v849_v7 = vld [vmem:[#allocation9 + $0x18] sm:$0xff]  ;;  %v855_v8 = vld [vmem:[#allocation9 + $0x48] sm:$0xff]  ;;  %v848_v9 = vld [vmem:[#allocation9 + $0x10] sm:$0xff] }
  0x32   :  { %369 = vmatpush.bf16.msra.mxu2 %v629_v27  ;;  %v854_v10 = vld [vmem:[#allocation9 + $0x40] sm:$0xff]  ;;  %v847_v11 = vld [vmem:[#allocation9 + $0x8] sm:$0xff]  ;;  %v197_v13 = vld [vmem:[%s1092_s5] sm:$0x3] }
  0x33   :  { %v846_v12 = vld [vmem:[#allocation9] sm:$0xff]  ;;  %v200_v14 = vperm.slane %v197_v13, 1  ;;  %v199_v19 = vperm.slane %v197_v13, 0  ;;  %v871_v33 = vld [vmem:[%s1094_s7] ss:$0 sm:$0xff] }
  0x34   :  { %382 = vmatpush.bf16.msra.mxu3 %v693_v31 }
  0x35   :  { %394 = vmatpush.bf16.msrb.mxu0 %v641_v22  ;;  %407 = vmatpush.bf16.msrb.mxu1 %v705_v23 }
  0x36   :  { %370 = vmatpush.bf16.msra.mxu2 %v621_v39  ;;  %v578_v39 = vstv %s1087_s0 }
  0x38   :  { %383 = vmatpush.bf16.msra.mxu3 %v685_v43 }
  0x39   :  { %395 = vmatpush.bf16.msrb.mxu0 %v633_v32  ;;  %408 = vmatpush.bf16.msrb.mxu1 %v697_v35 }
  0x3a   :  { %551 = vmatpush.bf16.msrb.mxu2 %v853_v49 }
  0x3c   :  { %564 = vmatpush.bf16.msrb.mxu3 %v861_v48 }
  0x3d   :  { %396 = vmatpush.bf16.msrb.mxu0 %v625_v44  ;;  %409 = vmatpush.bf16.msrb.mxu1 %v689_v47 }
  0x3e   :  { %552 = vmatpush.bf16.msrb.mxu2 %v852_v51 }
  0x40   :  { %565 = vmatpush.bf16.msrb.mxu3 %v860_v50 }
  0x42   :  { %553 = vmatpush.bf16.msrb.mxu2 %v851_v53 }
  0x44   :  { %566 = vmatpush.bf16.msrb.mxu3 %v859_v52 }
  0x46   :  { %554 = vmatpush.bf16.msrb.mxu2 %v850_v55 }
  0x48   :  { %567 = vmatpush.bf16.msrb.mxu3 %v858_v54 }
  0x4a   :  { %555 = vmatpush.bf16.msrb.mxu2 %v849_v7 }
  0x4c   :  { %568 = vmatpush.bf16.msrb.mxu3 %v857_v56 }
  0x4e   :  { %556 = vmatpush.bf16.msrb.mxu2 %v848_v9 }
  0x50   :  { %569 = vmatpush.bf16.msrb.mxu3 %v856_v58 }
  0x52   :  { %557 = vmatpush.bf16.msrb.mxu2 %v847_v11 }
  0x54   :  { %570 = vmatpush.bf16.msrb.mxu3 %v855_v8 }
  0x56   :  { %558 = vmatpush.bf16.msrb.mxu2 %v846_v12 }
  0x58   :  { %571 = vmatpush.bf16.msrb.mxu3 %v854_v10 }
  0x9d   :  { %v144_v61 = vpop.f32.mrf.mxu0 }
  0x9e   :  { %v145_v62 = vadd.f32 %v144_v61, %v102_v59 }
  0x9f   :  { %v157_v63 = vpop.f32.mrf.mxu1 }
  0xa0   :  { %v158_v0 = vadd.f32 %v157_v63, %v103_v60  ;;  %v161_v1 = vmax.f32 %v145_v62, 0.0 }
  0xa2   :  { %v162_v2 = vmax.f32 %v158_v0, 0.0  ;;  %v163_v3 = vpack.c.bf16 %v161_v1, %v161_v1 }
  0xa4   :  { %v164_v4 = vpack.c.bf16 %v162_v2, %v162_v2  ;;  %371 = vmatmul.bf16.vlgmr.msra.gmra.mxu2 %v163_v3  ;;  %397 = vmatmul.bf16.vlgmr.msrb.gmra.mxu0 %v163_v3 }
  0xa5   :  { %v146_v5 = vpop.f32.mrf.mxu0 }
  0xa6   :  { %384 = vmatmul.bf16.vlgmr.msra.gmra.mxu3 %v164_v4  ;;  %410 = vmatmul.bf16.vlgmr.msrb.gmra.mxu1 %v164_v4 }
  0xa7   :  { %v159_v6 = vpop.f32.mrf.mxu1 }
 0x121   :  { %v398_v15 = vpop.f32.mrf.mxu0 }
 0x122   :  { %v399_v16 = vadd.f32 %v398_v15, %v200_v14 }
 0x123   :  { %v411_v17 = vpop.f32.mrf.mxu1 }
 0x124   :  { %v412_v18 = vadd.f32 %v411_v17, %v399_v16 }
 0x126   :  { %v416_v20 = vmax.f32 %v412_v18, 0.0 }
 0x127   :  { %v372_v21 = vpop.f32.mrf.mxu2 }
 0x128   :  { %v418_v22 = vpack.c.bf16 %v416_v20, %v416_v20  ;;  %v373_v23 = vadd.f32 %v372_v21, %v199_v19 }
 0x129   :  { %v385_v24 = vpop.f32.mrf.mxu3  ;;  %v400_v25 = vpop.f32.mrf.mxu0 }
 0x12a   :  { %v386_v26 = vadd.f32 %v385_v24, %v373_v23  ;;  %572 = vmatmul.bf16.vlgmr.msrb.gmra.mxu3 %v418_v22 }
 0x12b   :  { %v413_v27 = vpop.f32.mrf.mxu1 }
 0x12c   :  { %v415_v28 = vmax.f32 %v386_v26, 0.0 }
 0x12e   :  { %v417_v29 = vpack.c.bf16 %v415_v28, %v415_v28 }
 0x12f   :  { %v374_v30 = vpop.f32.mrf.mxu2 }
 0x130   :  { %559 = vmatmul.bf16.vlgmr.msrb.gmra.mxu2 %v417_v29 }
 0x131   :  { %v387_v31 = vpop.f32.mrf.mxu3 }
 0x1ad   :  { %v573_v32 = vpop.f32.mrf.mxu3 }
 0x1b3   :  { %v560_v34 = vpop.f32.mrf.mxu2 }
 0x1b4   :  { %v561_v35 = vadd.f32 %v871_v33, %v560_v34 }
 0x1b5   :  { %v575_v36 = vpop.f32.mrf.mxu3 }
 0x1b6   :  { %v574_v37 = vadd.f32 %v573_v32, %v561_v35 }
 0x1b8   :  { %872 = vtanh.f32 %v574_v37 }
 0x1bb   :  { %v562_v38 = vpop.f32.mrf.mxu2 }
 0x1be   :  { %v873_v40 = vpop.eup %872 }
 0x1bf   :  { %v579_v41 = vmul.f32 %v873_v40, %v578_v39 }
 0x1c1   :  { %580 = vst [vmem:[#allocation11] sm:$0xff] %v579_v41 }
 0x1c2   :  { %591 = dma.vmem_to_hbm [thread:$0]  %s587_s10, 128, %s589_s13, [#allocation5]  }
 0x1c3   :  { %1000 = dma.done.wait [#allocation5], 128  }
 0x1c4   :  { %1001 = vsyncadd [#allocation5], 4294967168 }
 0x1c5   :  { %596 = vsyncpa [#allocation4], 1 }
 0x1c6   :  { %597 = vsyncpa [#allocation7], 1 }
 0x1c7   :  { %598 = vsyncpa [#allocation10], 1 }
 0x1c8   :  { %599 = vsyncpa [#allocation5], 1 }

</bundles_post_ra>
